<compile_context>
chip_gen: v7x
topology: tpu7x:2x2x1
jax: 0.10.0
libtpu: 0.0.40
codegen_flags: <defaults>
</compile_context>

<pallas_src>
import jax
import jax.numpy as jnp
from jax.experimental import pallas as pl
from jax.experimental.pallas import tpu as pltpu

_LANE = 128
_SUBLANE = 8
_BLOCK_BUDGET_BYTES = 12 * 1024 * 1024   # x/out blocks (double-buffered) + hidden temps
_MIN_GRID_STEPS = 8                      # enough steps to shard across 2 TCs (v7x)
_MIN_SPLIT_PIXELS = 8 * 1024             # don't split below ~256 KiB moved per step
_MAX_BATCH_BLOCK = 8                     # cap for the unrolled in-kernel batch loop


def _cdiv(a, b):
    return -(-a // b)


def _round_up(a, b):
    return _cdiv(a, b) * b


def _translation2d_kernel(x_ref, w1_ref, b1_ref, w2_ref, b2_ref, o_ref):
    # x_ref:  (Nb, C', TM)   pixels on lanes, channels on sublanes
    # w1_ref: (H', C') bf16  first 1x1 conv weight (out, in)
    # b1_ref: (H', 1)  f32
    # w2_ref: (O', H') bf16  second 1x1 conv weight (out, in)
    # b2_ref: (O', 1)  f32
    # o_ref:  (Nb, O', TM)
    w1 = w1_ref[...]
    b1 = b1_ref[...]
    w2 = w2_ref[...]
    b2 = b2_ref[...]
    for b in range(x_ref.shape[0]):                 # Nb is small and static
        x = x_ref[b].astype(jnp.bfloat16)                           # (C', TM)
        h = jnp.dot(w1, x, preferred_element_type=jnp.float32)      # (H', TM) f32
        h = jnp.maximum(h + b1, 0.0).astype(jnp.bfloat16)           # ReLU -> bf16
        y = jnp.dot(w2, h, preferred_element_type=jnp.float32)      # (O', TM) f32
        o_ref[b] = (y + b2).astype(o_ref.dtype)


def _fold_factor(n, c):
    """Fold F consecutive images into the channel/sublane axis while C*F <= 8."""
    if c >= _SUBLANE:
        return 1
    for f in range(min(n, _SUBLANE // c), 0, -1):
        if n % f == 0:
            return f
    return 1


def _choose_tiles(n_eff, c_eff, hidden_eff, out_eff, hw):
    """Pick (batch block, pixel tile) from a VMEM byte budget."""
    c_pad = _round_up(c_eff, _SUBLANE)
    o_pad = _round_up(out_eff, _SUBLANE)
    h_pad = _round_up(hidden_eff, _SUBLANE)
    # f32 x/out blocks are double-buffered; the hidden activation exists once
    # per step as f32 + bf16 temporaries.
    bytes_per_pixel = 2 * (c_pad + o_pad) * 4 + h_pad * 6
    target_pixels = max(_LANE, _BLOCK_BUDGET_BYTES // bytes_per_pixel)

    if hw <= _LANE:
        tm = hw                                       # full-extent block (legal, tiny)
    else:
        tm = min(target_pixels, _round_up(hw, _LANE))
        tm = max(_LANE, (tm // _LANE) * _LANE)        # lane-dense multiple of 128

    # Batch-block when one (small) tile already covers the whole image.
    nb = 1
    if _cdiv(hw, tm) == 1 and tm < target_pixels:
        nb = int(min(n_eff, max(1, target_pixels // max(tm, 1)), _MAX_BATCH_BLOCK))

    # Make sure there are enough grid steps for megacore sharding (v7x), but
    # never shrink a step below ~256 KiB of traffic.
    def steps(nb_, tm_):
        return _cdiv(n_eff, nb_) * _cdiv(hw, tm_)

    while steps(nb, tm) < _MIN_GRID_STEPS:
        if nb > 1:
            nb = max(1, nb // 2)
        elif tm >= 2 * _MIN_SPLIT_PIXELS:
            tm = max(_LANE, (tm // 2 // _LANE) * _LANE)
        else:
            break
    return nb, tm


@jax.jit
def translation2d_forward(x_nchw, w1, b1, w2, b2):
    """x_nchw: (N, C, H, W). w1: (8C, C), b1: (8C, 1), w2: (3, 8C), b2: (3, 1).

    Returns (N, 3, H, W) with the dtype of x."""
    N, C, H, W = x_nchw.shape
    hidden = w1.shape[0]
    out_ch = w2.shape[0]
    hw = H * W

    # Fold F consecutive images into the channel (sublane) axis: a pure
    # row-major reshape plus block-diagonal weights (no data movement on x).
    F = _fold_factor(N, C)
    n_eff, c_eff = N // F, C * F
    hidden_eff, out_eff = hidden * F, out_ch * F

    x3 = x_nchw.reshape(n_eff, c_eff, hw)            # pure reshape, no transpose

    eye = jnp.eye(F, dtype=w1.dtype)
    w1_eff = jnp.kron(eye, w1).astype(jnp.bfloat16)  # (H', C') block-diagonal, bf16
    w2_eff = jnp.kron(eye, w2).astype(jnp.bfloat16)  # (O', H') block-diagonal, bf16
    b1_eff = jnp.tile(b1, (F, 1))                    # (H', 1) f32
    b2_eff = jnp.tile(b2, (F, 1))                    # (O', 1) f32

    nb, tm = _choose_tiles(n_eff, c_eff, hidden_eff, out_eff, hw)
    grid = (_cdiv(n_eff, nb), _cdiv(hw, tm))

    # Explicit scoped-VMEM limit (v5e's default is only 16 MiB); blocks were
    # sized to stay well under 32 MiB, leaving headroom on v7x's 64 MiB.
    x_blk = nb * _round_up(c_eff, _SUBLANE) * _round_up(tm, _LANE) * 4
    o_blk = nb * _round_up(out_eff, _SUBLANE) * _round_up(tm, _LANE) * 4
    h_blk = _round_up(hidden_eff, _SUBLANE) * _round_up(tm, _LANE) * 6
    w_bytes = 2 * (w1_eff.size + w2_eff.size) + 4 * (b1_eff.size + b2_eff.size)
    est = 2 * (x_blk + o_blk) + h_blk + 2 * w_bytes + (4 << 20)
    vmem_limit = int(min(max(est, 32 << 20), 48 << 20))

    itemsize = x_nchw.dtype.itemsize
    flops = 2 * N * hw * (hidden * C + out_ch * hidden)
    bytes_accessed = (N * hw * (C + out_ch)) * itemsize \
        + 2 * (w1.size + w2.size) + 4 * (b1.size + b2.size)

    y3 = pl.pallas_call(
        _translation2d_kernel,
        out_shape=jax.ShapeDtypeStruct((n_eff, out_eff, hw), x_nchw.dtype),
        grid_spec=pltpu.PrefetchScalarGridSpec(
            num_scalar_prefetch=0,
            grid=grid,
            in_specs=[
                pl.BlockSpec((nb, c_eff, tm), lambda n, i: (n, 0, i)),       # x tile
                pl.BlockSpec((hidden_eff, c_eff), lambda n, i: (0, 0)),      # W1 resident
                pl.BlockSpec((hidden_eff, 1), lambda n, i: (0, 0)),          # b1
                pl.BlockSpec((out_eff, hidden_eff), lambda n, i: (0, 0)),    # W2 resident
                pl.BlockSpec((out_eff, 1), lambda n, i: (0, 0)),             # b2
            ],
            out_specs=pl.BlockSpec((nb, out_eff, tm), lambda n, i: (n, 0, i)),
        ),
        compiler_params=pltpu.CompilerParams(
            dimension_semantics=("parallel", "parallel"),
            vmem_limit_bytes=vmem_limit),
        cost_estimate=pl.CostEstimate(
            flops=int(flops), transcendentals=0,
            bytes_accessed=int(bytes_accessed)),
    )(x3, w1_eff, b1_eff, w2_eff, b2_eff)

    return y3.reshape(N, out_ch, H, W)


def init_params(key, channel):
    """Deterministic synthetic init matching Conv2d(C,8C,1) / Conv2d(8C,3,1).

    Conv weights in PyTorch are (out, in, 1, 1); here they are (out, in)
    matmul weights and biases are column vectors (out, 1)."""
    hidden = channel * 8
    k1, k2, k3, k4 = jax.random.split(key, 4)
    b1_bound = 1.0 / (channel ** 0.5)
    b2_bound = 1.0 / (hidden ** 0.5)
    w1 = jax.random.uniform(k1, (hidden, channel), jnp.float32, -b1_bound, b1_bound)
    b1 = jax.random.uniform(k2, (hidden, 1), jnp.float32, -b1_bound, b1_bound)
    w2 = jax.random.uniform(k3, (3, hidden), jnp.float32, -b2_bound, b2_bound)
    b2 = jax.random.uniform(k4, (3, 1), jnp.float32, -b2_bound, b2_bound)
    return w1, b1, w2, b2


def _reference(x_nchw, w1, b1, w2, b2):
    N, C, H, W = x_nchw.shape
    out_ch = w2.shape[0]
    xf = x_nchw.reshape(N, C, H * W)                              # (N, C, M)
    h = jnp.maximum(jnp.einsum("hc,ncm->nhm", w1, xf) + b1[None], 0.0)
    y = jnp.einsum("oh,nhm->nom", w2, h) + b2[None]
    return y.reshape(N, out_ch, H, W)


if __name__ == "__main__":
    key = jax.random.PRNGKey(0)
    k_x, k_p = jax.random.split(key)

    N, C, H, W = 2, 4, 16, 16          # batch=2, channel=4, spatial=16
    x = jax.random.normal(k_x, (N, C, H, W), dtype=jnp.float32)
    w1, b1, w2, b2 = init_params(k_p, C)

    y = translation2d_forward(x, w1, b1, w2, b2)
    jax.block_until_ready(y)

    assert y.shape == (N, 3, H, W), y.shape
    y_ref = _reference(x, w1, b1, w2, b2)
    # bf16 MXU matmuls with f32 accumulation: expect ~1e-2-level relative error
    # vs the pure-f32 reference, hence the loosened tolerance.
    assert jnp.allclose(y, y_ref, atol=5e-2, rtol=5e-2), "mismatch vs reference"

    print("KERNEL_OK")
</pallas_src>

<mosaic_0001>
module attributes {stable_mosaic.version = 11 : i64} {
  func.func @_translation2d_kernel(%arg0: i32, %arg1: i32, %arg2: memref<1x8x256xf32, #tpu.memory_space<vmem>>, %arg3: memref<64x8xbf16, #tpu.memory_space<vmem>>, %arg4: memref<64x1xf32, #tpu.memory_space<vmem>>, %arg5: memref<6x64xbf16, #tpu.memory_space<vmem>>, %arg6: memref<6x1xf32, #tpu.memory_space<vmem>>, %arg7: memref<1x6x256xf32, #tpu.memory_space<vmem>>) attributes {dimension_semantics = [#tpu.dimension_semantics<parallel>, #tpu.dimension_semantics<parallel>], iteration_bounds = array<i64: 1, 1>, scalar_prefetch = 0 : i64, scratch_operands = 0 : i64, tpu.core_type = #tpu.core_type<tc>, window_params = [{transform_indices = @transform_0, window_bounds = array<i64: 1, 8, 256>}, {pipeline_mode = #tpu.pipeline_mode<synchronous>, transform_indices = @transform_1, window_bounds = array<i64: 64, 8>}, {pipeline_mode = #tpu.pipeline_mode<synchronous>, transform_indices = @transform_2, window_bounds = array<i64: 64, 1>}, {pipeline_mode = #tpu.pipeline_mode<synchronous>, transform_indices = @transform_3, window_bounds = array<i64: 6, 64>}, {pipeline_mode = #tpu.pipeline_mode<synchronous>, transform_indices = @transform_4, window_bounds = array<i64: 6, 1>}, {transform_indices = @transform_5, window_bounds = array<i64: 1, 6, 256>}]} {
    %c0 = arith.constant 0 : index
    %c0_0 = arith.constant 0 : index
    %0 = vector.load %arg3[%c0, %c0_0] : memref<64x8xbf16, #tpu.memory_space<vmem>>, vector<64x8xbf16>
    %c0_1 = arith.constant 0 : index
    %c0_2 = arith.constant 0 : index
    %1 = vector.load %arg4[%c0_1, %c0_2] : memref<64x1xf32, #tpu.memory_space<vmem>>, vector<64x1xf32>
    %c0_3 = arith.constant 0 : index
    %c0_4 = arith.constant 0 : index
    %2 = vector.load %arg5[%c0_3, %c0_4] : memref<6x64xbf16, #tpu.memory_space<vmem>>, vector<6x64xbf16>
    %c0_5 = arith.constant 0 : index
    %c0_6 = arith.constant 0 : index
    %3 = vector.load %arg6[%c0_5, %c0_6] : memref<6x1xf32, #tpu.memory_space<vmem>>, vector<6x1xf32>
    %c0_7 = arith.constant 0 : index
    %c0_8 = arith.constant 0 : index
    %c0_9 = arith.constant 0 : index
    %4 = vector.load %arg2[%c0_7, %c0_8, %c0_9] : memref<1x8x256xf32, #tpu.memory_space<vmem>>, vector<1x8x256xf32>
    %5 = vector.shape_cast %4 : vector<1x8x256xf32> to vector<8x256xf32>
    %6 = arith.truncf %5 : vector<8x256xf32> to vector<8x256xbf16>
    %cst = arith.constant dense<0.000000e+00> : vector<64x256xf32>
    %7 = tpu.matmul %0, %6, %cst {dimension_numbers = #tpu.dot_dimension_numbers<[1], [0], [0], [1], [0, 0, 1, 1], [], []>} : vector<64x8xbf16>, vector<8x256xbf16>, vector<64x256xf32> -> vector<64x256xf32>
    %8 = vector.broadcast %1 : vector<64x1xf32> to vector<64x256xf32>
    %9 = arith.addf %7, %8 : vector<64x256xf32>
    %cst_10 = arith.constant 0.000000e+00 : f32
    %10 = vector.broadcast %cst_10 : f32 to vector<64x256xf32>
    %11 = arith.maximumf %9, %10 : vector<64x256xf32>
    %12 = arith.truncf %11 : vector<64x256xf32> to vector<64x256xbf16>
    %cst_11 = arith.constant dense<0.000000e+00> : vector<6x256xf32>
    %13 = tpu.matmul %2, %12, %cst_11 {dimension_numbers = #tpu.dot_dimension_numbers<[1], [0], [0], [1], [0, 0, 1, 1], [], []>} : vector<6x64xbf16>, vector<64x256xbf16>, vector<6x256xf32> -> vector<6x256xf32>
    %14 = vector.broadcast %3 : vector<6x1xf32> to vector<6x256xf32>
    %15 = arith.addf %13, %14 : vector<6x256xf32>
    %c0_12 = arith.constant 0 : index
    %c0_13 = arith.constant 0 : index
    %c0_14 = arith.constant 0 : index
    %16 = vector.load %arg7[%c0_12, %c0_13, %c0_14] : memref<1x6x256xf32, #tpu.memory_space<vmem>>, vector<1x6x256xf32>
    %17 = vector.shape_cast %16 : vector<1x6x256xf32> to vector<6x256xf32>
    %18 = vector.shape_cast %15 : vector<6x256xf32> to vector<1x6x256xf32>
    tpu.vector_store %arg7[%c0_12, %c0_13, %c0_14], %18 {strides = array<i32>} : memref<1x6x256xf32, #tpu.memory_space<vmem>>, vector<1x6x256xf32>,
    return
  }
  func.func @transform_0(%arg0: i32, %arg1: i32) -> (i32, i32, i32) {
    %c0_i32 = arith.constant 0 : i32
    %c0_i32_0 = arith.constant 0 : i32
    return %arg0, %c0_i32, %arg1 : i32, i32, i32
  }
  func.func @transform_1(%arg0: i32, %arg1: i32) -> (i32, i32) {
    %c0_i32 = arith.constant 0 : i32
    %c0_i32_0 = arith.constant 0 : i32
    %c0_i32_1 = arith.constant 0 : i32
    return %c0_i32, %c0_i32_0 : i32, i32
  }
  func.func @transform_2(%arg0: i32, %arg1: i32) -> (i32, i32) {
    %c0_i32 = arith.constant 0 : i32
    %c0_i32_0 = arith.constant 0 : i32
    %c0_i32_1 = arith.constant 0 : i32
    return %c0_i32, %c0_i32_0 : i32, i32
  }
  func.func @transform_3(%arg0: i32, %arg1: i32) -> (i32, i32) {
    %c0_i32 = arith.constant 0 : i32
    %c0_i32_0 = arith.constant 0 : i32
    %c0_i32_1 = arith.constant 0 : i32
    return %c0_i32, %c0_i32_0 : i32, i32
  }
  func.func @transform_4(%arg0: i32, %arg1: i32) -> (i32, i32) {
    %c0_i32 = arith.constant 0 : i32
    %c0_i32_0 = arith.constant 0 : i32
    %c0_i32_1 = arith.constant 0 : i32
    return %c0_i32, %c0_i32_0 : i32, i32
  }
  func.func @transform_5(%arg0: i32, %arg1: i32) -> (i32, i32, i32) {
    %c0_i32 = arith.constant 0 : i32
    %c0_i32_0 = arith.constant 0 : i32
    return %arg0, %c0_i32, %arg1 : i32, i32, i32
  }
}

</mosaic_0001>

<bundles_post_ra>
// kernel: translation2d_forward.1
= control target key start
LH: loop header
LB: loop body
LE: loop exit
PB: predicated region body
PF: predicated region fallthrough
CT: control target
= control target key end

     0   :  { %vm116_vm0 = vcmask 1043456   ;;  %v293_v2 = vmov 0   ;;  %vm103_vm1 = vcmask 64512   ;;  %vm225_vm2 = vcmask 523264   ;;  %s382_s0 = inlined_call_operand.vmem [shape: f32[1,8,256], index: 0, kind: input, shape index: {}]   ;;  %s383_s1 = inlined_call_operand.vmem [shape: bf16[64,8], index: 1, kind: input, shape index: {}]   ;;  %s384_s2 = inlined_call_operand.vmem [shape: f32[64,1], index: 2, kind: input, shape index: {}]   ;;  %s385_s4 = inlined_call_operand.vmem [shape: f32[6,1], index: 4, kind: input, shape index: {}]   ;;  %s386_s3 = inlined_call_operand.vmem [shape: bf16[6,64], index: 3, kind: input, shape index: {}]   ;;  %s387_s5 = inlined_call_operand.vmem [shape: f32[1,6,256], index: 5, kind: output, shape index: {}]  }
   0x1   :  { %v40_v0 = vld [vmem:[%s382_s0 + $0x8] sm:$0xff]  ;;  %v39_v1 = vld [vmem:[%s382_s0] sm:$0xff]  ;;  %155 = vmatprep.mubr.bf16.mxu0 %v293_v2  ;;  %287 = vset.pattern.permute.xlu0 %v293_v2  ;;  %v31_v8 = vld [vmem:[%s384_s2 + $0x10] sm:$0xff] }
   0x2   :  { %v42_v3 = vpack.c.bf16 %v40_v0, %v40_v0  ;;  %v41_v4 = vpack.c.bf16 %v39_v1, %v39_v1  ;;  %288 = vset.pattern.permute.xlu1 %v293_v2  ;;  %261 = vmatprep.mubr.bf16.mxu1 %v293_v2  ;;  %v289_v6 = vld [vmem:[%s383_s1] sm:$0xff]   ;;  %v30_v9 = vld [vmem:[%s384_s2 + $0x8] sm:$0xff]  ;;  %v32_v10 = vld [vmem:[%s384_s2 + $0x18] sm:$0xff] }
   0x3   :  { %v29_v7 = vld [vmem:[%s384_s2] sm:$0xff]  ;;  %55 = vperm.xlu1 %288, %v31_v8   ;;  %v290_v12 = vld [vmem:[%s383_s1 + $0x8] sm:$0xff]   ;;  %v35_v14 = vld [vmem:[%s384_s2 + $0x30] sm:$0xff] }
   0x4   :  { %280 = vmatprep.subr.msk.bf16.mxu0 %vm116_vm0, %v42_v3  ;;  %v118_v5 = vsel %vm116_vm0, %v41_v4, 0  ;;  %45 = vperm.xlu0 %287, %v29_v7   ;;  %v33_v11 = vld [vmem:[%s384_s2 + $0x20] sm:$0xff]  ;;  %v34_v13 = vld [vmem:[%s384_s2 + $0x28] sm:$0xff]  ;;  %v36_v15 = vld [vmem:[%s384_s2 + $0x38] sm:$0xff] }
   0x5   :  { %124 = vmatpush1.bf16.msra.mxu0 %v118_v5  ;;  %v38_v16 = vld [vmem:[%s385_s4] sm:$0x3f]  ;;  %v291_v17 = vld [vmem:[%s383_s1 + $0x10] sm:$0xff]   ;;  %v292_v18 = vld [vmem:[%s383_s1 + $0x18] sm:$0xff]  }
   0x7   :  { %60 = vperm.xlu1 %288, %v32_v10  }
   0x8   :  { %281 = vmatmul.mubr.msk.bf16.vlgmr.msra.gmra.mrb[0].mxu0 %vm103_vm1, %v289_v6  ;;  %50 = vperm.xlu0 %287, %v30_v9  }
   0x9   :  { %165 = vmatprep.mubr.bf16.mxu0 %v293_v2 }
   0xb   :  { %70 = vperm.xlu1 %288, %v34_v13  }
   0xc   :  { %65 = vperm.xlu0 %287, %v33_v11  }
   0xf   :  { %80 = vperm.xlu1 %288, %v36_v15  }
  0x10   :  { %282 = vmatmul.mubr.msk.bf16.gmra.mrb[4].mxu0 %vm103_vm1, %v290_v12  ;;  %75 = vperm.xlu0 %287, %v35_v14  }
  0x11   :  { %175 = vmatprep.mubr.bf16.mxu0 %v293_v2 }
  0x14   :  { %222 = vperm.xlu0 %287, %v38_v16  }
  0x18   :  { %283 = vmatmul.mubr.msk.bf16.gmra.mrb[8].mxu0 %vm103_vm1, %v291_v17 }
  0x19   :  { %185 = vmatprep.mubr.bf16.mxu0 %v293_v2 }
  0x20   :  { %284 = vmatmul.mubr.msk.bf16.gmra.mrb[12].mxu0 %vm103_vm1, %v292_v18 }
  0x82   :  { %v56_v28 = vpop.permute.xlu1 %55 }
  0x83   :  { %v46_v19 = vpop.permute.xlu0 %45 }
  0x86   :  { %v61_v39 = vpop.permute.xlu1 %60 }
  0x87   :  { %v51_v23 = vpop.permute.xlu0 %50 }
  0x8a   :  { %v71_v55 = vpop.permute.xlu1 %70 }
  0x8b   :  { %v66_v50 = vpop.permute.xlu0 %65 }
  0x8e   :  { %v81_v7 = vpop.permute.xlu1 %80 }
  0x8f   :  { %v76_v2 = vpop.permute.xlu0 %75 }
  0xdb   :  { %v157_v20 = vpop.f32.mrb[0].mxu0 }
  0xdc   :  { %v158_v21 = vadd.f32 %v157_v20, %v46_v19  ;;  %v159_v22 = vpop.f32.mrb[1].mxu0  ;;  %v223_v20 = vpop.permute.xlu0 %222 }
  0xdd   :  { %v160_v24 = vadd.f32 %v159_v22, %v46_v19  ;;  %v161_v25 = vpop.f32.mrb[2].mxu0  ;;  %v37_v19 = vld [vmem:[%s386_s3] sm:$0x7] }
  0xde   :  { %v162_v26 = vadd.f32 %v161_v25, %v51_v23  ;;  %v163_v27 = vpop.f32.mrb[3].mxu0  ;;  %v196_v30 = vmax.f32 %v158_v21, 0.0 }
  0xdf   :  { %v164_v29 = vadd.f32 %v163_v27, %v51_v23  ;;  %v197_v32 = vmax.f32 %v160_v24, 0.0 }
  0xe0   :  { %v198_v31 = vmax.f32 %v162_v26, 0.0 }
  0xe1   :  { %v199_v33 = vmax.f32 %v164_v29, 0.0 }
  0xe2   :  { %v212_v34 = vpack.c.bf16 %v198_v31, %v196_v30 }
  0xe3   :  { %v167_v35 = vpop.f32.mrb[4].mxu0  ;;  %v213_v36 = vpack.c.bf16 %v199_v33, %v197_v32 }
  0xe4   :  { %v168_v37 = vadd.f32 %v167_v35, %v56_v28  ;;  %v169_v38 = vpop.f32.mrb[5].mxu0 }
  0xe5   :  { %v170_v40 = vadd.f32 %v169_v38, %v56_v28  ;;  %v171_v41 = vpop.f32.mrb[6].mxu0  ;;  %229 = vmatprep.subr.bf16.mxu1 %v213_v36 }
  0xe6   :  { %v172_v42 = vadd.f32 %v171_v41, %v61_v39  ;;  %v173_v43 = vpop.f32.mrb[7].mxu0  ;;  %230 = vmatpush1.bf16.msra.mxu1 %v212_v34  ;;  %v200_v45 = vmax.f32 %v168_v37, 0.0 }
  0xe7   :  { %v174_v44 = vadd.f32 %v173_v43, %v61_v39  ;;  %v201_v47 = vmax.f32 %v170_v40, 0.0 }
  0xe8   :  { %v202_v46 = vmax.f32 %v172_v42, 0.0 }
  0xe9   :  { %v203_v48 = vmax.f32 %v174_v44, 0.0 }
  0xea   :  { %v214_v49 = vpack.c.bf16 %v202_v46, %v200_v45 }
  0xeb   :  { %v215_v51 = vpack.c.bf16 %v203_v48, %v201_v47  ;;  %v177_v52 = vpop.f32.mrb[8].mxu0 }
  0xec   :  { %v178_v53 = vadd.f32 %v177_v52, %v66_v50  ;;  %v179_v54 = vpop.f32.mrb[9].mxu0 }
  0xed   :  { %v180_v56 = vadd.f32 %v179_v54, %v66_v50  ;;  %v181_v57 = vpop.f32.mrb[10].mxu0  ;;  %231 = vmatprep.subr.bf16.mxu1 %v215_v51 }
  0xee   :  { %v182_v58 = vadd.f32 %v181_v57, %v71_v55  ;;  %v183_v59 = vpop.f32.mrb[11].mxu0  ;;  %232 = vmatpush1.bf16.msra.mxu1 %v214_v49  ;;  %v204_v61 = vmax.f32 %v178_v53, 0.0 }
  0xef   :  { %v184_v60 = vadd.f32 %v183_v59, %v71_v55  ;;  %v205_v63 = vmax.f32 %v180_v56, 0.0 }
  0xf0   :  { %v206_v62 = vmax.f32 %v182_v58, 0.0 }
  0xf1   :  { %v207_v0 = vmax.f32 %v184_v60, 0.0 }
  0xf2   :  { %v216_v1 = vpack.c.bf16 %v206_v62, %v204_v61 }
  0xf3   :  { %v217_v3 = vpack.c.bf16 %v207_v0, %v205_v63  ;;  %v187_v4 = vpop.f32.mrb[12].mxu0 }
  0xf4   :  { %v188_v5 = vadd.f32 %v187_v4, %v76_v2  ;;  %v189_v6 = vpop.f32.mrb[13].mxu0 }
  0xf5   :  { %v190_v8 = vadd.f32 %v189_v6, %v76_v2  ;;  %v191_v9 = vpop.f32.mrb[14].mxu0  ;;  %233 = vmatprep.subr.bf16.mxu1 %v217_v3 }
  0xf6   :  { %v192_v10 = vadd.f32 %v191_v9, %v81_v7  ;;  %v193_v11 = vpop.f32.mrb[15].mxu0  ;;  %234 = vmatpush1.bf16.msra.mxu1 %v216_v1  ;;  %v208_v13 = vmax.f32 %v188_v5, 0.0 }
  0xf7   :  { %v194_v12 = vadd.f32 %v193_v11, %v81_v7  ;;  %v209_v15 = vmax.f32 %v190_v8, 0.0 }
  0xf8   :  { %v210_v14 = vmax.f32 %v192_v10, 0.0 }
  0xf9   :  { %v211_v16 = vmax.f32 %v194_v12, 0.0 }
  0xfa   :  { %v218_v17 = vpack.c.bf16 %v210_v14, %v208_v13 }
  0xfb   :  { %v219_v18 = vpack.c.bf16 %v211_v16, %v209_v15 }
  0xfd   :  { %235 = vmatprep.subr.bf16.mxu1 %v219_v18 }
  0xfe   :  { %236 = vmatpush1.bf16.msra.mxu1 %v218_v17 }
 0x101   :  { %285 = vmatmul.mubr.msk.bf16.vlgmr.msra.gmra.mrb[0].mxu1 %vm225_vm2, %v37_v19 }
 0x1d4   :  { %v263_v21 = vpop.f32.mrb[0].mxu1 }
 0x1d5   :  { %v264_v22 = vadd.f32 %v263_v21, %v223_v20  ;;  %v265_v23 = vpop.f32.mrb[1].mxu1 }
 0x1d6   :  { %v266_v24 = vadd.f32 %v265_v23, %v223_v20  ;;  %v267_v25 = vpop.f32.mrb[2].mxu1 }
 0x1d7   :  { %270 = vst [vmem:[%s387_s5] sm:$0x3f] %v264_v22  ;;  %v268_v26 = vpop.f32.mrb[3].mxu1 }
 0x1d8   :  { %271 = vst [vmem:[%s387_s5 + $0x8] sm:$0x3f] %v266_v24 }

</bundles_post_ra>
